<compile_context>
chip_gen: v7x
topology: tpu7x:2x2x1
jax: 0.10.0
libtpu: 0.0.40
codegen_flags: <defaults>
</compile_context>

<pallas_src>
import functools
import math

import numpy as np
import jax
import jax.numpy as jnp
from jax.experimental import pallas as pl
from jax.experimental.pallas import tpu as pltpu


# -----------------------------------------------------------------------------
# Pallas kernel 1: fused segmentation head  conv3x3(SAME) -> ReLU -> conv3x3
#
# Layout trick: the zero-padded image (H+2, W+2) is flattened row-major so the
# lane axis is the whole spatial extent.  For tap (kh, kw) the needed input is
# a contiguous flat slice at offset kh*(W+2)+kw; the two extra columns per row
# produce "junk" output columns that are masked before re-padding the hidden
# activation and are stripped (cheap slice) after the kernel.
# -----------------------------------------------------------------------------
def _seg_head_kernel(x_ref, w1_ref, b1_ref, w2_ref, b2_ref, mask_ref,
                     o_ref, hpad_ref, *, H, W, A):
    Wp = W + 2
    L = H * Wp                      # flat conv-output length (W valid + 2 junk / row)
    hidden = w1_ref.shape[1]
    c_out = w2_ref.shape[1]

    # ---- conv1: 9 shifted matmuls, f32 accumulate on the MXU -----------------
    acc1 = jnp.zeros((hidden, L), jnp.float32)
    for kh in range(3):
        for kw in range(3):
            t = kh * 3 + kw
            s = kh * Wp + kw
            slab = x_ref[0, :, s:s + L]                      # (C_in, L)
            acc1 = acc1 + jnp.dot(w1_ref[t], slab,
                                  preferred_element_type=jnp.float32)
    # bias + ReLU, then zero the junk columns so they act as zero padding.
    hval = jnp.maximum(acc1 + b1_ref[...], 0.0) * mask_ref[...]

    # ---- re-pad hidden activation inside VMEM (no HBM round-trip) ------------
    hpad_ref[...] = jnp.zeros_like(hpad_ref)
    hpad_ref[:, A:A + L] = hval      # A is 128-aligned -> unrotated lane store

    # ---- conv2: 9 shifted matmuls over the padded hidden ---------------------
    acc2 = jnp.zeros((c_out, L), jnp.float32)
    base = A - (Wp + 1)              # valid pixel (h, w) of layer 1 sits at A + h*Wp + w
    for kh in range(3):
        for kw in range(3):
            t = kh * 3 + kw
            s = base + kh * Wp + kw
            slab = hpad_ref[:, s:s + L]                      # (hidden, L)
            acc2 = acc2 + jnp.dot(w2_ref[t], slab,
                                  preferred_element_type=jnp.float32)
    o_ref[0] = (acc2 + b2_ref[...]).astype(o_ref.dtype)


def seg_head_conv(x, w1, b1, w2, b2):
    """x: (B, C_in, H, W) NCHW; w*: (C_out, C_in, 3, 3); b*: (C_out,)."""
    B, C_in, H, W = x.shape
    hidden = w1.shape[0]
    c_out = w2.shape[0]
    Wp = W + 2
    L = H * Wp
    Lx = (H + 2) * Wp + 2                       # flat padded input (+2 slack for last tap)
    A = ((Wp + 1 + 127) // 128) * 128           # 128-aligned offset of hidden data
    Lh = A + L + Wp + 2                         # hidden scratch lane extent

    # Pad + flatten (contiguous in NCHW -> pure reshape, no transpose).
    xpad = jnp.pad(x, ((0, 0), (0, 0), (1, 1), (1, 1)))
    xflat = xpad.reshape(B, C_in, (H + 2) * Wp)
    xflat = jnp.pad(xflat, ((0, 0), (0, 0), (0, Lx - (H + 2) * Wp)))

    # Pack weights tap-major: tap t = kh*3+kw -> (C_out, C_in) slab.
    w1_t = jnp.transpose(w1, (2, 3, 0, 1)).reshape(9, hidden, C_in)
    w2_t = jnp.transpose(w2, (2, 3, 0, 1)).reshape(9, c_out, hidden)
    b1_c = b1.reshape(hidden, 1)
    b2_c = b2.reshape(c_out, 1)

    # 1.0 on valid columns (w < W), 0.0 on the two junk columns per row.
    col = np.arange(L) % Wp
    colmask = jnp.asarray((col < W).astype(np.float32)).reshape(1, L)

    out_flat = pl.pallas_call(
        functools.partial(_seg_head_kernel, H=H, W=W, A=A),
        out_shape=jax.ShapeDtypeStruct((B, c_out, L), jnp.float32),
        grid=(B,),
        in_specs=[
            pl.BlockSpec((1, C_in, Lx), lambda b: (b, 0, 0)),      # pipelined per image
            pl.BlockSpec((9, hidden, C_in), lambda b: (0, 0, 0)),  # resident weights
            pl.BlockSpec((hidden, 1), lambda b: (0, 0)),
            pl.BlockSpec((9, c_out, hidden), lambda b: (0, 0, 0)),
            pl.BlockSpec((c_out, 1), lambda b: (0, 0)),
            pl.BlockSpec((1, L), lambda b: (0, 0)),
        ],
        out_specs=pl.BlockSpec((1, c_out, L), lambda b: (b, 0, 0)),
        scratch_shapes=[pltpu.VMEM((hidden, Lh), jnp.float32)],
        compiler_params=pltpu.CompilerParams(
            dimension_semantics=("parallel",)),
    )(xflat, w1_t, b1_c, w2_t, b2_c, colmask)

    # Strip the 2 junk columns per row (cheap slice), result is NCHW already.
    return out_flat.reshape(B, c_out, H, Wp)[:, :, :, :W]


# -----------------------------------------------------------------------------
# Pallas kernel 2: batched separable bicubic upsample + clip_sr (clamp [0,1])
# -----------------------------------------------------------------------------
def _cubic(x, a=-0.75):
    x = abs(x)
    if x <= 1.0:
        return (a + 2.0) * x ** 3 - (a + 3.0) * x ** 2 + 1.0
    if x < 2.0:
        return a * x ** 3 - 5.0 * a * x ** 2 + 8.0 * a * x - 4.0 * a
    return 0.0


def _bicubic_matrix(n_in, scale):
    """Interpolation matrix (n_in*scale, n_in); align_corners=False, a=-0.75."""
    n_out = n_in * scale
    M = np.zeros((n_out, n_in), dtype=np.float32)
    for i in range(n_out):
        src = (i + 0.5) / scale - 0.5
        base = int(math.floor(src))
        t = src - base
        for k in range(-1, 3):
            wgt = _cubic(k - t)
            idx = min(max(base + k, 0), n_in - 1)
            M[i, idx] += wgt
    return M


def _bicubic_clip_kernel(x_ref, wwt_ref, wh_ref, o_ref, *, G, H, Ho):
    # width pass: one large lane-dense matmul over all G images in the block
    t = jnp.dot(x_ref[...], wwt_ref[...],
                preferred_element_type=jnp.float32)          # (G*H, Wo)
    # height pass per image (sublane-aligned slices), clip fused
    for g in range(G):
        og = jnp.dot(wh_ref[...], t[g * H:(g + 1) * H, :],
                     preferred_element_type=jnp.float32)     # (Ho, Wo)
        o_ref[g * Ho:(g + 1) * Ho, :] = jnp.clip(og, 0.0, 1.0).astype(o_ref.dtype)


def _largest_divisor_leq(n, cap):
    for d in range(min(n, cap), 0, -1):
        if n % d == 0:
            return d
    return 1


def bicubic_upsample_clip(x, scale, images_per_block=8):
    """x: (B, C, H, W) -> bicubic upsample by `scale`, clipped to [0, 1]."""
    B, C, H, W = x.shape
    Ho, Wo = H * scale, W * scale
    N = B * C
    G = _largest_divisor_leq(N, images_per_block)   # images per grid step

    wh = jnp.asarray(_bicubic_matrix(H, scale))                              # (Ho, H)
    wwt = jnp.asarray(np.ascontiguousarray(_bicubic_matrix(W, scale).T))     # (W, Wo)

    xr = x.reshape(N * H, W)
    out = pl.pallas_call(
        functools.partial(_bicubic_clip_kernel, G=G, H=H, Ho=Ho),
        out_shape=jax.ShapeDtypeStruct((N * Ho, Wo), jnp.float32),
        grid=(N // G,),
        in_specs=[
            pl.BlockSpec((G * H, W), lambda i: (i, 0)),
            pl.BlockSpec((W, Wo), lambda i: (0, 0)),     # resident
            pl.BlockSpec((Ho, H), lambda i: (0, 0)),     # resident
        ],
        out_specs=pl.BlockSpec((G * Ho, Wo), lambda i: (i, 0)),
        compiler_params=pltpu.CompilerParams(
            dimension_semantics=("parallel",)),
    )(xr, wwt, wh)
    return out.reshape(B, C, Ho, Wo)


# -----------------------------------------------------------------------------
# JointInvModel (Pallas)
# -----------------------------------------------------------------------------
class JointInvModelPallas:
    def __init__(self, key, scale_factor=2, in_channels=3, hidden=8,
                 num_classes=1, blur_kernel_size=5):
        self.scale_factor = scale_factor
        self.blur_kernel_size = blur_kernel_size
        k1, k2, k3, k4 = jax.random.split(key, 4)
        # segmentation head: conv3x3(in->hidden) + ReLU + conv3x3(hidden->num_classes)
        self.w1 = 0.1 * jax.random.normal(k1, (hidden, in_channels, 3, 3), jnp.float32)
        self.b1 = 0.01 * jax.random.normal(k2, (hidden,), jnp.float32)
        self.w2 = 0.1 * jax.random.normal(k3, (num_classes, hidden, 3, 3), jnp.float32)
        self.b2 = 0.01 * jax.random.normal(k4, (num_classes,), jnp.float32)

    def forward(self, x):
        # forward_ss: segmentation model (stand-in head; aux output is None)
        lr_segment_preds = seg_head_conv(x, self.w1, self.b1, self.w2, self.b2)

        # forward_sr (sr_model == 'bicubic'): upsample seg map by scale_factor,
        # with clip_sr (clamp to [0, 1]) fused into the Pallas kernel.
        segment_preds = bicubic_upsample_clip(lr_segment_preds, self.scale_factor)

        # TODO(synk): kernel_targets is never supplied in JointInvModel.forward;
        # emit zeros with a nominal (B, k*k) blur-kernel shape.
        B = x.shape[0]
        kernel_preds = jnp.zeros((B, self.blur_kernel_size ** 2), jnp.float32)

        return lr_segment_preds, segment_preds, kernel_preds


# -----------------------------------------------------------------------------
# Pure-JAX reference (for a correctness self-check)
# -----------------------------------------------------------------------------
def _reference_forward(x, model):
    dn = ('NCHW', 'OIHW', 'NCHW')
    h = jax.lax.conv_general_dilated(x, model.w1, (1, 1), 'SAME',
                                     dimension_numbers=dn)
    h = jnp.maximum(h + model.b1[None, :, None, None], 0.0)
    lr = jax.lax.conv_general_dilated(h, model.w2, (1, 1), 'SAME',
                                      dimension_numbers=dn)
    lr = lr + model.b2[None, :, None, None]
    s = model.scale_factor
    wh = jnp.asarray(_bicubic_matrix(x.shape[2], s))
    wwt = jnp.asarray(_bicubic_matrix(x.shape[3], s).T)
    sr = jnp.einsum('oh,bchw,wx->bcox', wh, lr, wwt)
    return lr, jnp.clip(sr, 0.0, 1.0)


if __name__ == "__main__":
    key = jax.random.PRNGKey(0)
    k_x, k_p = jax.random.split(key)
    x = jax.random.uniform(k_x, (2, 3, 16, 16), dtype=jnp.float32)  # NCHW LR input

    model = JointInvModelPallas(k_p, scale_factor=2)
    outs = model.forward(x)
    outs = jax.block_until_ready(outs)

    lr_seg, seg, kern = outs
    assert lr_seg.shape == (2, 1, 16, 16)
    assert seg.shape == (2, 1, 32, 32)
    assert kern.shape == (2, 25)
    assert float(seg.min()) >= 0.0 and float(seg.max()) <= 1.0

    # numerical self-check against a pure-JAX reference
    ref_lr, ref_sr = _reference_forward(x, model)
    np.testing.assert_allclose(np.asarray(lr_seg), np.asarray(ref_lr),
                               atol=1e-2, rtol=1e-2)
    np.testing.assert_allclose(np.asarray(seg), np.asarray(ref_sr),
                               atol=1e-2, rtol=1e-2)

    print("KERNEL_OK")
</pallas_src>

<mosaic_0001>
module attributes {stable_mosaic.version = 11 : i64} {
  func.func @_seg_head_kernel(%arg0: i32, %arg1: memref<1x3x326xf32, #tpu.memory_space<vmem>>, %arg2: memref<9x8x3xf32, #tpu.memory_space<vmem>>, %arg3: memref<8x1xf32, #tpu.memory_space<vmem>>, %arg4: memref<9x1x8xf32, #tpu.memory_space<vmem>>, %arg5: memref<1x1xf32, #tpu.memory_space<vmem>>, %arg6: memref<1x288xf32, #tpu.memory_space<vmem>>, %arg7: memref<1x1x288xf32, #tpu.memory_space<vmem>>, %arg8: memref<8x436xf32, #tpu.memory_space<vmem>>) attributes {dimension_semantics = [#tpu.dimension_semantics<parallel>], iteration_bounds = array<i64: 2>, scalar_prefetch = 0 : i64, scratch_operands = 1 : i64, tpu.core_type = #tpu.core_type<tc>, window_params = [{transform_indices = @transform_0, window_bounds = array<i64: 1, 3, 326>}, {pipeline_mode = #tpu.pipeline_mode<synchronous>, transform_indices = @transform_1, window_bounds = array<i64: 9, 8, 3>}, {pipeline_mode = #tpu.pipeline_mode<synchronous>, transform_indices = @transform_2, window_bounds = array<i64: 8, 1>}, {pipeline_mode = #tpu.pipeline_mode<synchronous>, transform_indices = @transform_3, window_bounds = array<i64: 9, 1, 8>}, {pipeline_mode = #tpu.pipeline_mode<synchronous>, transform_indices = @transform_4, window_bounds = array<i64: 1, 1>}, {pipeline_mode = #tpu.pipeline_mode<synchronous>, transform_indices = @transform_5, window_bounds = array<i64: 1, 288>}, {transform_indices = @transform_6, window_bounds = array<i64: 1, 1, 288>}]} {
    %cst = arith.constant 0.000000e+00 : f32
    %0 = vector.broadcast %cst : f32 to vector<8x288xf32>
    %c0 = arith.constant 0 : index
    %c0_0 = arith.constant 0 : index
    %c0_1 = arith.constant 0 : index
    %1 = vector.load %arg1[%c0, %c0_0, %c0_1] : memref<1x3x326xf32, #tpu.memory_space<vmem>>, vector<1x3x288xf32>
    %2 = vector.shape_cast %1 : vector<1x3x288xf32> to vector<3x288xf32>
    %c0_2 = arith.constant 0 : index
    %c0_3 = arith.constant 0 : index
    %c0_4 = arith.constant 0 : index
    %3 = vector.load %arg2[%c0_2, %c0_3, %c0_4] : memref<9x8x3xf32, #tpu.memory_space<vmem>>, vector<1x8x3xf32>
    %4 = vector.shape_cast %3 : vector<1x8x3xf32> to vector<8x3xf32>
    %cst_5 = arith.constant dense<0.000000e+00> : vector<8x288xf32>
    %5 = tpu.matmul %4, %2, %cst_5 {dimension_numbers = #tpu.dot_dimension_numbers<[1], [0], [0], [1], [0, 0, 1, 1], [], []>} : vector<8x3xf32>, vector<3x288xf32>, vector<8x288xf32> -> vector<8x288xf32>
    %6 = arith.addf %0, %5 : vector<8x288xf32>
    %c0_6 = arith.constant 0 : index
    %c0_7 = arith.constant 0 : index
    %c1 = arith.constant 1 : index
    %7 = vector.load %arg1[%c0_6, %c0_7, %c1] : memref<1x3x326xf32, #tpu.memory_space<vmem>>, vector<1x3x288xf32>
    %8 = vector.shape_cast %7 : vector<1x3x288xf32> to vector<3x288xf32>
    %c1_8 = arith.constant 1 : index
    %c0_9 = arith.constant 0 : index
    %c0_10 = arith.constant 0 : index
    %9 = vector.load %arg2[%c1_8, %c0_9, %c0_10] : memref<9x8x3xf32, #tpu.memory_space<vmem>>, vector<1x8x3xf32>
    %10 = vector.shape_cast %9 : vector<1x8x3xf32> to vector<8x3xf32>
    %cst_11 = arith.constant dense<0.000000e+00> : vector<8x288xf32>
    %11 = tpu.matmul %10, %8, %cst_11 {dimension_numbers = #tpu.dot_dimension_numbers<[1], [0], [0], [1], [0, 0, 1, 1], [], []>} : vector<8x3xf32>, vector<3x288xf32>, vector<8x288xf32> -> vector<8x288xf32>
    %12 = arith.addf %6, %11 : vector<8x288xf32>
    %c0_12 = arith.constant 0 : index
    %c0_13 = arith.constant 0 : index
    %c2 = arith.constant 2 : index
    %13 = vector.load %arg1[%c0_12, %c0_13, %c2] : memref<1x3x326xf32, #tpu.memory_space<vmem>>, vector<1x3x288xf32>
    %14 = vector.shape_cast %13 : vector<1x3x288xf32> to vector<3x288xf32>
    %c2_14 = arith.constant 2 : index
    %c0_15 = arith.constant 0 : index
    %c0_16 = arith.constant 0 : index
    %15 = vector.load %arg2[%c2_14, %c0_15, %c0_16] : memref<9x8x3xf32, #tpu.memory_space<vmem>>, vector<1x8x3xf32>
    %16 = vector.shape_cast %15 : vector<1x8x3xf32> to vector<8x3xf32>
    %cst_17 = arith.constant dense<0.000000e+00> : vector<8x288xf32>
    %17 = tpu.matmul %16, %14, %cst_17 {dimension_numbers = #tpu.dot_dimension_numbers<[1], [0], [0], [1], [0, 0, 1, 1], [], []>} : vector<8x3xf32>, vector<3x288xf32>, vector<8x288xf32> -> vector<8x288xf32>
    %18 = arith.addf %12, %17 : vector<8x288xf32>
    %c0_18 = arith.constant 0 : index
    %c0_19 = arith.constant 0 : index
    %c18 = arith.constant 18 : index
    %19 = vector.load %arg1[%c0_18, %c0_19, %c18] : memref<1x3x326xf32, #tpu.memory_space<vmem>>, vector<1x3x288xf32>
    %20 = vector.shape_cast %19 : vector<1x3x288xf32> to vector<3x288xf32>
    %c3 = arith.constant 3 : index
    %c0_20 = arith.constant 0 : index
    %c0_21 = arith.constant 0 : index
    %21 = vector.load %arg2[%c3, %c0_20, %c0_21] : memref<9x8x3xf32, #tpu.memory_space<vmem>>, vector<1x8x3xf32>
    %22 = vector.shape_cast %21 : vector<1x8x3xf32> to vector<8x3xf32>
    %cst_22 = arith.constant dense<0.000000e+00> : vector<8x288xf32>
    %23 = tpu.matmul %22, %20, %cst_22 {dimension_numbers = #tpu.dot_dimension_numbers<[1], [0], [0], [1], [0, 0, 1, 1], [], []>} : vector<8x3xf32>, vector<3x288xf32>, vector<8x288xf32> -> vector<8x288xf32>
    %24 = arith.addf %18, %23 : vector<8x288xf32>
    %c0_23 = arith.constant 0 : index
    %c0_24 = arith.constant 0 : index
    %c19 = arith.constant 19 : index
    %25 = vector.load %arg1[%c0_23, %c0_24, %c19] : memref<1x3x326xf32, #tpu.memory_space<vmem>>, vector<1x3x288xf32>
    %26 = vector.shape_cast %25 : vector<1x3x288xf32> to vector<3x288xf32>
    %c4 = arith.constant 4 : index
    %c0_25 = arith.constant 0 : index
    %c0_26 = arith.constant 0 : index
    %27 = vector.load %arg2[%c4, %c0_25, %c0_26] : memref<9x8x3xf32, #tpu.memory_space<vmem>>, vector<1x8x3xf32>
    %28 = vector.shape_cast %27 : vector<1x8x3xf32> to vector<8x3xf32>
    %cst_27 = arith.constant dense<0.000000e+00> : vector<8x288xf32>
    %29 = tpu.matmul %28, %26, %cst_27 {dimension_numbers = #tpu.dot_dimension_numbers<[1], [0], [0], [1], [0, 0, 1, 1], [], []>} : vector<8x3xf32>, vector<3x288xf32>, vector<8x288xf32> -> vector<8x288xf32>
    %30 = arith.addf %24, %29 : vector<8x288xf32>
    %c0_28 = arith.constant 0 : index
    %c0_29 = arith.constant 0 : index
    %c20 = arith.constant 20 : index
    %31 = vector.load %arg1[%c0_28, %c0_29, %c20] : memref<1x3x326xf32, #tpu.memory_space<vmem>>, vector<1x3x288xf32>
    %32 = vector.shape_cast %31 : vector<1x3x288xf32> to vector<3x288xf32>
    %c5 = arith.constant 5 : index
    %c0_30 = arith.constant 0 : index
    %c0_31 = arith.constant 0 : index
    %33 = vector.load %arg2[%c5, %c0_30, %c0_31] : memref<9x8x3xf32, #tpu.memory_space<vmem>>, vector<1x8x3xf32>
    %34 = vector.shape_cast %33 : vector<1x8x3xf32> to vector<8x3xf32>
    %cst_32 = arith.constant dense<0.000000e+00> : vector<8x288xf32>
    %35 = tpu.matmul %34, %32, %cst_32 {dimension_numbers = #tpu.dot_dimension_numbers<[1], [0], [0], [1], [0, 0, 1, 1], [], []>} : vector<8x3xf32>, vector<3x288xf32>, vector<8x288xf32> -> vector<8x288xf32>
    %36 = arith.addf %30, %35 : vector<8x288xf32>
    %c0_33 = arith.constant 0 : index
    %c0_34 = arith.constant 0 : index
    %c36 = arith.constant 36 : index
    %37 = vector.load %arg1[%c0_33, %c0_34, %c36] : memref<1x3x326xf32, #tpu.memory_space<vmem>>, vector<1x3x288xf32>
    %38 = vector.shape_cast %37 : vector<1x3x288xf32> to vector<3x288xf32>
    %c6 = arith.constant 6 : index
    %c0_35 = arith.constant 0 : index
    %c0_36 = arith.constant 0 : index
    %39 = vector.load %arg2[%c6, %c0_35, %c0_36] : memref<9x8x3xf32, #tpu.memory_space<vmem>>, vector<1x8x3xf32>
    %40 = vector.shape_cast %39 : vector<1x8x3xf32> to vector<8x3xf32>
    %cst_37 = arith.constant dense<0.000000e+00> : vector<8x288xf32>
    %41 = tpu.matmul %40, %38, %cst_37 {dimension_numbers = #tpu.dot_dimension_numbers<[1], [0], [0], [1], [0, 0, 1, 1], [], []>} : vector<8x3xf32>, vector<3x288xf32>, vector<8x288xf32> -> vector<8x288xf32>
    %42 = arith.addf %36, %41 : vector<8x288xf32>
    %c0_38 = arith.constant 0 : index
    %c0_39 = arith.constant 0 : index
    %c37 = arith.constant 37 : index
    %43 = vector.load %arg1[%c0_38, %c0_39, %c37] : memref<1x3x326xf32, #tpu.memory_space<vmem>>, vector<1x3x288xf32>
    %44 = vector.shape_cast %43 : vector<1x3x288xf32> to vector<3x288xf32>
    %c7 = arith.constant 7 : index
    %c0_40 = arith.constant 0 : index
    %c0_41 = arith.constant 0 : index
    %45 = vector.load %arg2[%c7, %c0_40, %c0_41] : memref<9x8x3xf32, #tpu.memory_space<vmem>>, vector<1x8x3xf32>
    %46 = vector.shape_cast %45 : vector<1x8x3xf32> to vector<8x3xf32>
    %cst_42 = arith.constant dense<0.000000e+00> : vector<8x288xf32>
    %47 = tpu.matmul %46, %44, %cst_42 {dimension_numbers = #tpu.dot_dimension_numbers<[1], [0], [0], [1], [0, 0, 1, 1], [], []>} : vector<8x3xf32>, vector<3x288xf32>, vector<8x288xf32> -> vector<8x288xf32>
    %48 = arith.addf %42, %47 : vector<8x288xf32>
    %c0_43 = arith.constant 0 : index
    %c0_44 = arith.constant 0 : index
    %c38 = arith.constant 38 : index
    %49 = vector.load %arg1[%c0_43, %c0_44, %c38] : memref<1x3x326xf32, #tpu.memory_space<vmem>>, vector<1x3x288xf32>
    %50 = vector.shape_cast %49 : vector<1x3x288xf32> to vector<3x288xf32>
    %c8 = arith.constant 8 : index
    %c0_45 = arith.constant 0 : index
    %c0_46 = arith.constant 0 : index
    %51 = vector.load %arg2[%c8, %c0_45, %c0_46] : memref<9x8x3xf32, #tpu.memory_space<vmem>>, vector<1x8x3xf32>
    %52 = vector.shape_cast %51 : vector<1x8x3xf32> to vector<8x3xf32>
    %cst_47 = arith.constant dense<0.000000e+00> : vector<8x288xf32>
    %53 = tpu.matmul %52, %50, %cst_47 {dimension_numbers = #tpu.dot_dimension_numbers<[1], [0], [0], [1], [0, 0, 1, 1], [], []>} : vector<8x3xf32>, vector<3x288xf32>, vector<8x288xf32> -> vector<8x288xf32>
    %54 = arith.addf %48, %53 : vector<8x288xf32>
    %c0_48 = arith.constant 0 : index
    %c0_49 = arith.constant 0 : index
    %55 = vector.load %arg3[%c0_48, %c0_49] : memref<8x1xf32, #tpu.memory_space<vmem>>, vector<8x1xf32>
    %56 = vector.broadcast %55 : vector<8x1xf32> to vector<8x288xf32>
    %57 = arith.addf %54, %56 : vector<8x288xf32>
    %cst_50 = arith.constant 0.000000e+00 : f32
    %58 = vector.broadcast %cst_50 : f32 to vector<8x288xf32>
    %59 = arith.maximumf %57, %58 : vector<8x288xf32>
    %c0_51 = arith.constant 0 : index
    %c0_52 = arith.constant 0 : index
    %60 = vector.load %arg6[%c0_51, %c0_52] : memref<1x288xf32, #tpu.memory_space<vmem>>, vector<1x288xf32>
    %61 = vector.broadcast %60 : vector<1x288xf32> to vector<8x288xf32>
    %62 = arith.mulf %59, %61 : vector<8x288xf32>
    %cst_53 = arith.constant 0.000000e+00 : f32
    %63 = vector.broadcast %cst_53 : f32 to vector<8x436xf32>
    %c0_54 = arith.constant 0 : index
    %c0_55 = arith.constant 0 : index
    %64 = vector.load %arg8[%c0_54, %c0_55] : memref<8x436xf32, #tpu.memory_space<vmem>>, vector<8x436xf32>
    tpu.vector_store %arg8[%c0_54, %c0_55], %63 {strides = array<i32>} : memref<8x436xf32, #tpu.memory_space<vmem>>, vector<8x436xf32>,
    %c0_56 = arith.constant 0 : index
    %c128 = arith.constant 128 : index
    %65 = vector.load %arg8[%c0_56, %c128] : memref<8x436xf32, #tpu.memory_space<vmem>>, vector<8x288xf32>
    tpu.vector_store %arg8[%c0_56, %c128], %62 {strides = array<i32>} : memref<8x436xf32, #tpu.memory_space<vmem>>, vector<8x288xf32>,
    %cst_57 = arith.constant 0.000000e+00 : f32
    %66 = vector.broadcast %cst_57 : f32 to vector<1x288xf32>
    %c0_58 = arith.constant 0 : index
    %c109 = arith.constant 109 : index
    %67 = vector.load %arg8[%c0_58, %c109] : memref<8x436xf32, #tpu.memory_space<vmem>>, vector<8x288xf32>
    %c0_59 = arith.constant 0 : index
    %c0_60 = arith.constant 0 : index
    %c0_61 = arith.constant 0 : index
    %68 = vector.load %arg4[%c0_59, %c0_60, %c0_61] : memref<9x1x8xf32, #tpu.memory_space<vmem>>, vector<1x1x8xf32>
    %69 = vector.shape_cast %68 : vector<1x1x8xf32> to vector<1x8xf32>
    %cst_62 = arith.constant dense<0.000000e+00> : vector<1x288xf32>
    %70 = tpu.matmul %69, %67, %cst_62 {dimension_numbers = #tpu.dot_dimension_numbers<[1], [0], [0], [1], [0, 0, 1, 1], [], []>} : vector<1x8xf32>, vector<8x288xf32>, vector<1x288xf32> -> vector<1x288xf32>
    %71 = arith.addf %66, %70 : vector<1x288xf32>
    %c0_63 = arith.constant 0 : index
    %c110 = arith.constant 110 : index
    %72 = vector.load %arg8[%c0_63, %c110] : memref<8x436xf32, #tpu.memory_space<vmem>>, vector<8x288xf32>
    %c1_64 = arith.constant 1 : index
    %c0_65 = arith.constant 0 : index
    %c0_66 = arith.constant 0 : index
    %73 = vector.load %arg4[%c1_64, %c0_65, %c0_66] : memref<9x1x8xf32, #tpu.memory_space<vmem>>, vector<1x1x8xf32>
    %74 = vector.shape_cast %73 : vector<1x1x8xf32> to vector<1x8xf32>
    %cst_67 = arith.constant dense<0.000000e+00> : vector<1x288xf32>
    %75 = tpu.matmul %74, %72, %cst_67 {dimension_numbers = #tpu.dot_dimension_numbers<[1], [0], [0], [1], [0, 0, 1, 1], [], []>} : vector<1x8xf32>, vector<8x288xf32>, vector<1x288xf32> -> vector<1x288xf32>
    %76 = arith.addf %71, %75 : vector<1x288xf32>
    %c0_68 = arith.constant 0 : index
    %c111 = arith.constant 111 : index
    %77 = vector.load %arg8[%c0_68, %c111] : memref<8x436xf32, #tpu.memory_space<vmem>>, vector<8x288xf32>
    %c2_69 = arith.constant 2 : index
    %c0_70 = arith.constant 0 : index
    %c0_71 = arith.constant 0 : index
    %78 = vector.load %arg4[%c2_69, %c0_70, %c0_71] : memref<9x1x8xf32, #tpu.memory_space<vmem>>, vector<1x1x8xf32>
    %79 = vector.shape_cast %78 : vector<1x1x8xf32> to vector<1x8xf32>
    %cst_72 = arith.constant dense<0.000000e+00> : vector<1x288xf32>
    %80 = tpu.matmul %79, %77, %cst_72 {dimension_numbers = #tpu.dot_dimension_numbers<[1], [0], [0], [1], [0, 0, 1, 1], [], []>} : vector<1x8xf32>, vector<8x288xf32>, vector<1x288xf32> -> vector<1x288xf32>
    %81 = arith.addf %76, %80 : vector<1x288xf32>
    %c0_73 = arith.constant 0 : index
    %c127 = arith.constant 127 : index
    %82 = vector.load %arg8[%c0_73, %c127] : memref<8x436xf32, #tpu.memory_space<vmem>>, vector<8x288xf32>
    %c3_74 = arith.constant 3 : index
    %c0_75 = arith.constant 0 : index
    %c0_76 = arith.constant 0 : index
    %83 = vector.load %arg4[%c3_74, %c0_75, %c0_76] : memref<9x1x8xf32, #tpu.memory_space<vmem>>, vector<1x1x8xf32>
    %84 = vector.shape_cast %83 : vector<1x1x8xf32> to vector<1x8xf32>
    %cst_77 = arith.constant dense<0.000000e+00> : vector<1x288xf32>
    %85 = tpu.matmul %84, %82, %cst_77 {dimension_numbers = #tpu.dot_dimension_numbers<[1], [0], [0], [1], [0, 0, 1, 1], [], []>} : vector<1x8xf32>, vector<8x288xf32>, vector<1x288xf32> -> vector<1x288xf32>
    %86 = arith.addf %81, %85 : vector<1x288xf32>
    %c0_78 = arith.constant 0 : index
    %c128_79 = arith.constant 128 : index
    %87 = vector.load %arg8[%c0_78, %c128_79] : memref<8x436xf32, #tpu.memory_space<vmem>>, vector<8x288xf32>
    %c4_80 = arith.constant 4 : index
    %c0_81 = arith.constant 0 : index
    %c0_82 = arith.constant 0 : index
    %88 = vector.load %arg4[%c4_80, %c0_81, %c0_82] : memref<9x1x8xf32, #tpu.memory_space<vmem>>, vector<1x1x8xf32>
    %89 = vector.shape_cast %88 : vector<1x1x8xf32> to vector<1x8xf32>
    %cst_83 = arith.constant dense<0.000000e+00> : vector<1x288xf32>
    %90 = tpu.matmul %89, %87, %cst_83 {dimension_numbers = #tpu.dot_dimension_numbers<[1], [0], [0], [1], [0, 0, 1, 1], [], []>} : vector<1x8xf32>, vector<8x288xf32>, vector<1x288xf32> -> vector<1x288xf32>
    %91 = arith.addf %86, %90 : vector<1x288xf32>
    %c0_84 = arith.constant 0 : index
    %c129 = arith.constant 129 : index
    %92 = vector.load %arg8[%c0_84, %c129] : memref<8x436xf32, #tpu.memory_space<vmem>>, vector<8x288xf32>
    %c5_85 = arith.constant 5 : index
    %c0_86 = arith.constant 0 : index
    %c0_87 = arith.constant 0 : index
    %93 = vector.load %arg4[%c5_85, %c0_86, %c0_87] : memref<9x1x8xf32, #tpu.memory_space<vmem>>, vector<1x1x8xf32>
    %94 = vector.shape_cast %93 : vector<1x1x8xf32> to vector<1x8xf32>
    %cst_88 = arith.constant dense<0.000000e+00> : vector<1x288xf32>
    %95 = tpu.matmul %94, %92, %cst_88 {dimension_numbers = #tpu.dot_dimension_numbers<[1], [0], [0], [1], [0, 0, 1, 1], [], []>} : vector<1x8xf32>, vector<8x288xf32>, vector<1x288xf32> -> vector<1x288xf32>
    %96 = arith.addf %91, %95 : vector<1x288xf32>
    %c0_89 = arith.constant 0 : index
    %c145 = arith.constant 145 : index
    %97 = vector.load %arg8[%c0_89, %c145] : memref<8x436xf32, #tpu.memory_space<vmem>>, vector<8x288xf32>
    %c6_90 = arith.constant 6 : index
    %c0_91 = arith.constant 0 : index
    %c0_92 = arith.constant 0 : index
    %98 = vector.load %arg4[%c6_90, %c0_91, %c0_92] : memref<9x1x8xf32, #tpu.memory_space<vmem>>, vector<1x1x8xf32>
    %99 = vector.shape_cast %98 : vector<1x1x8xf32> to vector<1x8xf32>
    %cst_93 = arith.constant dense<0.000000e+00> : vector<1x288xf32>
    %100 = tpu.matmul %99, %97, %cst_93 {dimension_numbers = #tpu.dot_dimension_numbers<[1], [0], [0], [1], [0, 0, 1, 1], [], []>} : vector<1x8xf32>, vector<8x288xf32>, vector<1x288xf32> -> vector<1x288xf32>
    %101 = arith.addf %96, %100 : vector<1x288xf32>
    %c0_94 = arith.constant 0 : index
    %c146 = arith.constant 146 : index
    %102 = vector.load %arg8[%c0_94, %c146] : memref<8x436xf32, #tpu.memory_space<vmem>>, vector<8x288xf32>
    %c7_95 = arith.constant 7 : index
    %c0_96 = arith.constant 0 : index
    %c0_97 = arith.constant 0 : index
    %103 = vector.load %arg4[%c7_95, %c0_96, %c0_97] : memref<9x1x8xf32, #tpu.memory_space<vmem>>, vector<1x1x8xf32>
    %104 = vector.shape_cast %103 : vector<1x1x8xf32> to vector<1x8xf32>
    %cst_98 = arith.constant dense<0.000000e+00> : vector<1x288xf32>
    %105 = tpu.matmul %104, %102, %cst_98 {dimension_numbers = #tpu.dot_dimension_numbers<[1], [0], [0], [1], [0, 0, 1, 1], [], []>} : vector<1x8xf32>, vector<8x288xf32>, vector<1x288xf32> -> vector<1x288xf32>
    %106 = arith.addf %101, %105 : vector<1x288xf32>
    %c0_99 = arith.constant 0 : index
    %c147 = arith.constant 147 : index
    %107 = vector.load %arg8[%c0_99, %c147] : memref<8x436xf32, #tpu.memory_space<vmem>>, vector<8x288xf32>
    %c8_100 = arith.constant 8 : index
    %c0_101 = arith.constant 0 : index
    %c0_102 = arith.constant 0 : index
    %108 = vector.load %arg4[%c8_100, %c0_101, %c0_102] : memref<9x1x8xf32, #tpu.memory_space<vmem>>, vector<1x1x8xf32>
    %109 = vector.shape_cast %108 : vector<1x1x8xf32> to vector<1x8xf32>
    %cst_103 = arith.constant dense<0.000000e+00> : vector<1x288xf32>
    %110 = tpu.matmul %109, %107, %cst_103 {dimension_numbers = #tpu.dot_dimension_numbers<[1], [0], [0], [1], [0, 0, 1, 1], [], []>} : vector<1x8xf32>, vector<8x288xf32>, vector<1x288xf32> -> vector<1x288xf32>
    %111 = arith.addf %106, %110 : vector<1x288xf32>
    %c0_104 = arith.constant 0 : index
    %c0_105 = arith.constant 0 : index
    %112 = vector.load %arg5[%c0_104, %c0_105] : memref<1x1xf32, #tpu.memory_space<vmem>>, vector<1x1xf32>
    %113 = vector.broadcast %112 : vector<1x1xf32> to vector<1x288xf32>
    %114 = arith.addf %111, %113 : vector<1x288xf32>
    %c0_106 = arith.constant 0 : index
    %c0_107 = arith.constant 0 : index
    %c0_108 = arith.constant 0 : index
    %115 = vector.load %arg7[%c0_106, %c0_107, %c0_108] : memref<1x1x288xf32, #tpu.memory_space<vmem>>, vector<1x1x288xf32>
    %116 = vector.shape_cast %115 : vector<1x1x288xf32> to vector<1x288xf32>
    %117 = vector.shape_cast %114 : vector<1x288xf32> to vector<1x1x288xf32>
    tpu.vector_store %arg7[%c0_106, %c0_107, %c0_108], %117 {strides = array<i32>} : memref<1x1x288xf32, #tpu.memory_space<vmem>>, vector<1x1x288xf32>,
    return
  }
  func.func @transform_0(%arg0: i32) -> (i32, i32, i32) {
    %c0_i32 = arith.constant 0 : i32
    %c0_i32_0 = arith.constant 0 : i32
    %c0_i32_1 = arith.constant 0 : i32
    return %arg0, %c0_i32, %c0_i32_0 : i32, i32, i32
  }
  func.func @transform_1(%arg0: i32) -> (i32, i32, i32) {
    %c0_i32 = arith.constant 0 : i32
    %c0_i32_0 = arith.constant 0 : i32
    %c0_i32_1 = arith.constant 0 : i32
    %c0_i32_2 = arith.constant 0 : i32
    return %c0_i32, %c0_i32_0, %c0_i32_1 : i32, i32, i32
  }
  func.func @transform_2(%arg0: i32) -> (i32, i32) {
    %c0_i32 = arith.constant 0 : i32
    %c0_i32_0 = arith.constant 0 : i32
    %c0_i32_1 = arith.constant 0 : i32
    return %c0_i32, %c0_i32_0 : i32, i32
  }
  func.func @transform_3(%arg0: i32) -> (i32, i32, i32) {
    %c0_i32 = arith.constant 0 : i32
    %c0_i32_0 = arith.constant 0 : i32
    %c0_i32_1 = arith.constant 0 : i32
    %c0_i32_2 = arith.constant 0 : i32
    return %c0_i32, %c0_i32_0, %c0_i32_1 : i32, i32, i32
  }
  func.func @transform_4(%arg0: i32) -> (i32, i32) {
    %c0_i32 = arith.constant 0 : i32
    %c0_i32_0 = arith.constant 0 : i32
    %c0_i32_1 = arith.constant 0 : i32
    return %c0_i32, %c0_i32_0 : i32, i32
  }
  func.func @transform_5(%arg0: i32) -> (i32, i32) {
    %c0_i32 = arith.constant 0 : i32
    %c0_i32_0 = arith.constant 0 : i32
    %c0_i32_1 = arith.constant 0 : i32
    return %c0_i32, %c0_i32_0 : i32, i32
  }
  func.func @transform_6(%arg0: i32) -> (i32, i32, i32) {
    %c0_i32 = arith.constant 0 : i32
    %c0_i32_0 = arith.constant 0 : i32
    %c0_i32_1 = arith.constant 0 : i32
    return %arg0, %c0_i32, %c0_i32_0 : i32, i32, i32
  }
}

</mosaic_0001>

<bundles_post_ra>
// kernel: tpu_custom_call.1
= control target key start
LH: loop header
LB: loop body
LE: loop exit
PB: predicated region body
PF: predicated region fallthrough
CT: control target
= control target key end

     0   :  { %s4226_s0 = inlined_call_operand.vmem [shape: f32[2,3,326], index: 0, kind: input, shape index: {}]   ;;  %s4227_s1 = inlined_call_operand.vmem [shape: f32[9,8,3], index: 1, kind: input, shape index: {}]   ;;  %s4228_s2 = inlined_call_operand.vmem [shape: f32[8,1], index: 2, kind: input, shape index: {}]   ;;  %s4229_s3 = inlined_call_operand.vmem [shape: f32[9,1,8], index: 3, kind: input, shape index: {}]   ;;  %s4230_s4 = inlined_call_operand.<no memory space> [shape: f32[1,1], index: 4, kind: input, shape index: {}]   ;;  %s4231_s5 = inlined_call_operand.vmem [shape: f32[1,288], index: 5, kind: input, shape index: {}]   ;;  %s4232_s6 = inlined_call_operand.hbm [shape: f32[2,1,288], index: 6, kind: output, shape index: {}]  }
   0x1   :  { %v11_v0 = vstv %s4230_s4 }
   0x2   :  { %12 = vst [vmem:[#allocation3] sm:$0x1] %v11_v0 }
   0x3   :  { %13 = vsyncpa [#allocation5], 0 }
   0x4   :  { %15 = vsyncpa [#allocation5 + $0x1], 0  ;;  %s3795_s23 = smov 0   ;;  %s3797_s24 = smov 0  }
   0x5   :  { %s3799_s25 = smov 0   ;;  %s3801_s26 = smov 0  }
   0x6 LB: > { %s3816_s4 = sadd.s32 4294967295, %s3737_s26   ;;  %s3362_s27 = sadd.s32 4294967294, %s3737_s26   ;;  %s3737_s26 = sphi %s3801_s26, %s4238_s26   ;;  %s3733_s25 = sphi %s3799_s25, %s4237_s25   ;;  %s3729_s24 = sphi %s3797_s24, %s4236_s24   ;;  %s3725_s23 = sphi %s3795_s23, %s4235_s23  }
   0x7   : > { %s3820_s28 = sadd.s32 1, %s3737_s26   ;;  %s159_s29 = sadd.s32 1, %s3733_s25 }
   0x8   : > { %s156_s30 = ssub.s32 %s3737_s26, %s3820_s28  ;;  %p169_p0 = scmp.ne.s32.totalorder %s3733_s25, %s3729_s24 }
   0x9   : > { %p157_p1 = scmp.eq.s32.totalorder %s156_s30, 0  ;;  %p170_p2 = scmp.eq.s32.totalorder %s3816_s4, 1 }
   0xa   : > { %p175_p3 = scmp.ne.s32.totalorder %s3729_s24, %s3725_s23  ;;  %p176_p4 = scmp.eq.s32.totalorder %s3362_s27, 1 }
   0xb   : > { %s3831_s7 = scalar_select %p157_p1, %s3733_s25, %s159_s29  }
   0xc   : > { %p3833_p5 = por %p170_p2, %p169_p0  ;;  %p3837_p6 = por %p176_p4, %p175_p3 }
   0xd   : > { %p3365_p7 = scmp.ge.s32.totalorder %s3737_s26, 1  ;;  %p217_p8 = scmp.lt.s32.totalorder %s3737_s26, 3 }
   0xf   : > { %p218_p9 = pnand %p3365_p7, %p217_p8 }
  0x10   : > { %p247_p10 = scmp.lt.s32.totalorder (!%p218_p9), %s3816_s4, 1  ;;  %v3739_v1 = vmov (!%p218_p9), 0.0   ;;  %vm3740_vm0 = vmmov (!%p218_p9), 0   ;;  %s3741_s15 = smov (!%p218_p9), 127   ;;  %v1754_v26 = vld [vmem:[%s4228_s2] sm:$0xff] (!%p218_p9)  ;;  %v3749_v27 = vmov (!%p218_p9), 0  }
  0x11   : > { %221 = sbr.rel (%p218_p9) target bundleno = 859 (0x35b), region = 44  ;;  %3485 = vmatprep.subr.mxu1 (!%p218_p9), %v3739_v1  ;;  %344 = vmatprep.mubr.f32.mxu0 (!%p218_p9), %v3739_v1  ;;  %s3742_s16 = smov (!%p218_p9), 126   ;;  %vm273_vm1 = vcmask (!%p218_p9), 1042432   ;;  %vm266_vm2 = vcmask (!%p218_p9), 1039360   ;;  %v3367_v33 = vld [vmem:[%s4227_s1 + $0x8] sm:$0xff] (!%p218_p9)  ;;  %vm269_vm3 = vcmask (!%p218_p9), 23552  }
  0x12   : > { %3487 = vmatprep.mubr.msk.f32.mxu1 (!%p218_p9), %vm3740_vm0, %v3739_v1  ;;  %s3743_s17 = smov (!%p218_p9), 110   ;;  %s3744_s18 = smov (!%p218_p9), 109   ;;  %3666 = vset.pattern.permute.xlu0 (!%p218_p9), %v3749_v27  ;;  %vm584_vm4 = vcmask (!%p218_p9), 1031168   ;;  %v254_v39 = vld [vmem:[%s4227_s1] sm:$0xff] (!%p218_p9)  ;;  %vm753_vm5 = vcmask (!%p218_p9), 900096   ;;  %v3378_v44 = vld [vmem:[%s4227_s1 + $0x10] sm:$0xff] (!%p218_p9) }
  0x13   : > { %s3745_s19 = smov (!%p218_p9), 108   ;;  %s3746_s20 = smov (!%p218_p9), 92   ;;  %v3384_v47 = vld [vmem:[%s4227_s1 + $0x18] sm:$0xff] (!%p218_p9)  ;;  %vm922_vm6 = vcmask (!%p218_p9), 891904   ;;  %v3390_v52 = vld [vmem:[%s4227_s1 + $0x20] sm:$0xff] (!%p218_p9)  ;;  %v3396_v55 = vld [vmem:[%s4227_s1 + $0x28] sm:$0xff] (!%p218_p9) }
  0x14   : > { %s3747_s21 = smov (!%p218_p9), 91   ;;  %s3748_s22 = smov (!%p218_p9), 90   ;;  %vm1091_vm7 = vcmask (!%p218_p9), 883712   ;;  %v3402_v61 = vld [vmem:[%s4227_s1 + $0x30] sm:$0xff] (!%p218_p9)  ;;  %vm1260_vm8 = vcmask (!%p218_p9), 752640   ;;  %vm1429_vm9 = vcmask (!%p218_p9), 744448  }
  0x15   : > { %vm1598_vm10 = vcmask (!%p218_p9), 736256   ;;  %vm1789_vm11 = vcmask (!%p218_p9), 424960   ;;  %vm1793_vm12 = vcmask (!%p218_p9), 261120   ;;  %s3754_s27 = smov (!%p218_p9), 111   ;;  %vm1814_vm13 = vcmask (!%p218_p9), 146432   ;;  %s3609_s30 = smul.u32 (!%p218_p9), 48, %s3816_s4 }
  0x16   : > { %1790 = vst.msk [vmem:[#allocation2 + $0x18] sm:$0xff] (!%p218_p9), %vm1789_vm11, %v3739_v1  ;;  %vm1821_vm14 = vcmask (!%p218_p9), 64512   ;;  %vm1974_vm15 = vcmask (!%p218_p9), 154624  }
  0x18   : > { %s248_s10 = scalar_select %p247_p10, %s3816_s4, 1 }
  0x19   : > { %s3756_s4 = smov [#allocation4]  }
  0x1a   : > { %s3608_s11 = smul.u32 12, %s248_s10 }
  0x1c   : > { %s3850_s14 = scalar_lea.vmem %s4226_s0, %s3608_s11 }
  0x1d   : > { %v3855_v2 = vld [vmem:[%s3850_s14] sm:$0x77]  ;;  %v3867_v6 = vld [vmem:[%s3850_s14 + $0x8] sm:$0x7] }
  0x1e   : > { %v571_v3 = vld [vmem:[%s3850_s14] sm:$0x77]  ;;  %260 = vrot.lane.b32.xlu1 %v3855_v2, %s3741_s15  ;;  %v3862_v4 = vcombine.high %v3855_v2, %v3855_v2  ;;  %v572_v7 = vld [vmem:[%s3850_s14 + $0x8] sm:$0x7] }
  0x1f   : > { %v577_v5 = vcombine.high %v571_v3, %v571_v3  ;;  %v740_v8 = vld [vmem:[%s3850_s14] sm:$0x77]  ;;  %v741_v9 = vld [vmem:[%s3850_s14 + $0x8] sm:$0x7] }
  0x20   : > { %262 = vrot.lane.b32.xlu0 %v3862_v4, %s3741_s15  ;;  %v909_v10 = vld [vmem:[%s3850_s14] sm:$0x77]  ;;  %v746_v11 = vcombine.high %v740_v8, %v740_v8  ;;  %v910_v13 = vld [vmem:[%s3850_s14 + $0x8] sm:$0x7] }
  0x21   : > { %v915_v12 = vcombine.high %v909_v10, %v909_v10  ;;  %v1078_v14 = vld [vmem:[%s3850_s14] sm:$0x77]  ;;  %v1079_v15 = vld [vmem:[%s3850_s14 + $0x8] sm:$0x7] }
  0x22   : > { %580 = vrot.lane.b32.xlu1 %v577_v5, %s3742_s16  ;;  %v1247_v16 = vld [vmem:[%s3850_s14] sm:$0x77]  ;;  %v1084_v17 = vcombine.high %v1078_v14, %v1078_v14  ;;  %v1248_v19 = vld [vmem:[%s3850_s14 + $0x8] sm:$0x7] }
  0x23   : > { %v1253_v18 = vcombine.high %v1247_v16, %v1247_v16  ;;  %v1416_v20 = vld [vmem:[%s3850_s14] sm:$0x77]  ;;  %v1417_v21 = vld [vmem:[%s3850_s14 + $0x8] sm:$0x7] }
  0x24   : > { %264 = vrot.lane.b32.xlu0 %v3867_v6, %s3741_s15  ;;  %v1585_v22 = vld [vmem:[%s3850_s14] sm:$0x77]  ;;  %v1422_v23 = vcombine.high %v1416_v20, %v1416_v20  ;;  %v1586_v25 = vld [vmem:[%s3850_s14 + $0x8] sm:$0x7]  ;;  %s3750_s14 = smov 18  }
  0x25   : > { %v1591_v24 = vcombine.high %v1585_v22, %v1585_v22  ;;  %v3414_v5 = vld [vmem:[%s4227_s1 + $0x40] sm:$0xff] }
  0x26   : > { %578 = vrot.lane.b32.xlu1 %v571_v3, %s3742_s16 }
  0x28   : > { %582 = vrot.lane.b32.xlu0 %v572_v7, %s3742_s16 }
  0x2a   : > { %751 = vrot.lane.b32.xlu1 %v741_v9, %s3743_s17 }
  0x2c   : > { %749 = vrot.lane.b32.xlu0 %v746_v11, %s3743_s17 }
  0x2e   : > { %918 = vrot.lane.b32.xlu1 %v915_v12, %s3744_s18 }
  0x30   : > { %747 = vrot.lane.b32.xlu0 %v740_v8, %s3743_s17 }
  0x32   : > { %916 = vrot.lane.b32.xlu1 %v909_v10, %s3744_s18 }
  0x34   : > { %920 = vrot.lane.b32.xlu0 %v910_v13, %s3744_s18 }
  0x36   : > { %1089 = vrot.lane.b32.xlu1 %v1079_v15, %s3745_s19 }
  0x38   : > { %1087 = vrot.lane.b32.xlu0 %v1084_v17, %s3745_s19 }
  0x3a   : > { %1256 = vrot.lane.b32.xlu1 %v1253_v18, %s3746_s20 }
  0x3c   : > { %1085 = vrot.lane.b32.xlu0 %v1078_v14, %s3745_s19 }
  0x3e   : > { %1254 = vrot.lane.b32.xlu1 %v1247_v16, %s3746_s20 }
  0x40   : > { %1258 = vrot.lane.b32.xlu0 %v1248_v19, %s3746_s20  ;;  %s3751_s20 = smov 19  }
  0x42   : > { %1427 = vrot.lane.b32.xlu1 %v1417_v21, %s3747_s21 }
  0x44   : > { %1425 = vrot.lane.b32.xlu0 %v1422_v23, %s3747_s21 }
  0x46   : > { %1594 = vrot.lane.b32.xlu1 %v1591_v24, %s3748_s22 }
  0x48   : > { %1423 = vrot.lane.b32.xlu0 %v1416_v20, %s3747_s21  ;;  %s3752_s21 = smov 17  }
  0x4a   : > { %1592 = vrot.lane.b32.xlu1 %v1585_v22, %s3748_s22 }
  0x4c   : > { %1596 = vrot.lane.b32.xlu0 %v1586_v25, %s3748_s22  ;;  %s3753_s22 = smov 1  }
  0x50   : > { %1757 = vperm.xlu0 %3666, %v1754_v26  }
  0x54   : > { %1806 = vrot.lane.b32.xlu0 %v3739_v1, %s3750_s14 }
  0x90   : > { %v261_v28 = vpop.permute.xlu1 %260 }
  0x92   : > { %v263_v29 = vpop.permute.xlu0 %262 }
  0x93   : > { %v267_v34 = vsel %vm266_vm2, %v261_v28, %v263_v29 }
  0x94   : > { %v581_v30 = vpop.permute.xlu1 %580 }
  0x96   : > { %v265_v31 = vpop.permute.xlu0 %264 }
  0x97   : > { %3486 = vmatpush3.msk.msra.mxu1 %vm273_vm1, %v265_v31  ;;  %v268_v32 = vsel %vm266_vm2, %v263_v29, %v265_v31 }
  0x98   : > { %3368 = vmatprep.subr.msk.mxu0 %vm273_vm1, %v268_v32  ;;  %v579_v35 = vpop.permute.xlu1 %578  ;;  %3488 = vmatmul.mubr.msk.f32.vlgmr.msra.gmra.mrb[0].mxu1 %vm269_vm3, %v3367_v33 }
  0x99   : > { %3369 = vmatpush1.msk.msra.mxu0 %vm273_vm1, %v267_v34  ;;  %3490 = vmatprep.subr.mxu1 %v3739_v1  ;;  %v585_v41 = vsel %vm584_vm4, %v579_v35, %v581_v30  ;;  %v1768_v34 = vlaneseq }
  0x9a   : > { %3370 = vmatmul.mubr.msk.f32.vlgmr.msra.gmra.mrb[0].mxu0 %vm269_vm3, %v3367_v33  ;;  %3373 = vmatprep.subr.msk.mxu0 %vm273_vm1, %v3862_v4  ;;  %v583_v36 = vpop.permute.xlu0 %582 }
  0x9b   : > { %3374 = vmatpush1.msk.msra.mxu0 %vm273_vm1, %v3855_v2  ;;  %494 = vmatprep.mubr.f32.mxu0 %v3739_v1  ;;  %v586_v37 = vsel %vm584_vm4, %v581_v30, %v583_v36  ;;  %v3408_v2 = vld [vmem:[%s4227_s1 + $0x38] sm:$0xff]  ;;  %vm2770_vm4 = vcmask 908288  }
  0x9c   : > { %3379 = vmatprep.subr.msk.mxu0 %vm273_vm1, %v586_v37  ;;  %3491 = vmatpush3.msk.msra.mxu1 %vm273_vm1, %v3867_v6  ;;  %v752_v38 = vpop.permute.xlu1 %751 }
  0x9d   : > { %3492 = vmatprep.mubr.msk.f32.mxu1 %vm3740_vm0, %v3739_v1  ;;  %3495 = vmatprep.subr.mxu1 %v3739_v1 }
  0x9e   : > { %3493 = vmatmul.mubr.msk.f32.vlgmr.msra.gmra.mrb[2].mxu1 %vm269_vm3, %v254_v39  ;;  %v750_v40 = vpop.permute.xlu0 %749 }
  0x9f   : > { %3496 = vmatpush3.msk.msra.mxu1 %vm273_vm1, %v583_v36  ;;  %3497 = vmatprep.mubr.msk.f32.mxu1 %vm3740_vm0, %v3739_v1  ;;  %v755_v43 = vsel %vm753_vm5, %v750_v40, %v752_v38 }
  0xa0   : > { %3500 = vmatprep.subr.mxu1 %v3739_v1  ;;  %v919_v42 = vpop.permute.xlu1 %918 }
  0xa2   : > { %3375 = vmatmul.mubr.msk.f32.vlgmr.msra.gmra.mrb[0].mxu0 %vm269_vm3, %v254_v39  ;;  %v748_v45 = vpop.permute.xlu0 %747  ;;  %3498 = vmatmul.mubr.msk.f32.vlgmr.msra.gmra.mrb[4].mxu1 %vm269_vm3, %v3378_v44 }
  0xa3   : > { %3380 = vmatpush1.msk.msra.mxu0 %vm273_vm1, %v585_v41  ;;  %660 = vmatprep.mubr.f32.mxu0 %v3739_v1  ;;  %v754_v49 = vsel %vm753_vm5, %v748_v45, %v750_v40  ;;  %v1766_v41 = vld [vmem:[%s4231_s5] sm:$0x7] }
  0xa4   : > { %3385 = vmatprep.subr.msk.mxu0 %vm273_vm1, %v755_v43  ;;  %3501 = vmatpush3.msk.msra.mxu1 %vm273_vm1, %v752_v38  ;;  %v917_v46 = vpop.permute.xlu1 %916  ;;  %v4020_v38 = vshrl.u32 %v1768_v34, 7 }
  0xa5   : > { %3502 = vmatprep.mubr.msk.f32.mxu1 %vm3740_vm0, %v3739_v1  ;;  %3505 = vmatprep.subr.mxu1 %v3739_v1  ;;  %v923_v57 = vsel %vm922_vm6, %v917_v46, %v919_v42 }
  0xa6   : > { %v921_v48 = vpop.permute.xlu0 %920  ;;  %3503 = vmatmul.mubr.msk.f32.vlgmr.msra.gmra.mrb[6].mxu1 %vm269_vm3, %v3384_v47  ;;  %v1778_v39 = vsub.s32 2, %v4020_v38 }
  0xa7   : > { %3506 = vmatpush3.msk.msra.mxu1 %vm273_vm1, %v921_v48  ;;  %3507 = vmatprep.mubr.msk.f32.mxu1 %vm3740_vm0, %v3739_v1  ;;  %v924_v51 = vsel %vm922_vm6, %v919_v42, %v921_v48 }
  0xa8   : > { %v1090_v50 = vpop.permute.xlu1 %1089  ;;  %3510 = vmatprep.subr.mxu1 %v3739_v1  ;;  %v1779_v45 = vrot.slane %v1766_v41, %v1778_v39 }
  0xaa   : > { %3381 = vmatmul.mubr.msk.f32.vlgmr.msra.gmra.mrb[0].mxu0 %vm269_vm3, %v3378_v44  ;;  %v1088_v53 = vpop.permute.xlu0 %1087  ;;  %3508 = vmatmul.mubr.msk.f32.vlgmr.msra.gmra.mrb[8].mxu1 %vm269_vm3, %v3390_v52 }
  0xab   : > { %3386 = vmatpush1.msk.msra.mxu0 %vm273_vm1, %v754_v49  ;;  %829 = vmatprep.mubr.f32.mxu0 %v3739_v1  ;;  %v1093_v58 = vsel %vm1091_vm7, %v1088_v53, %v1090_v50  ;;  %v1770_v49 = vsub.s32 0, %v4020_v38 }
  0xac   : > { %3391 = vmatprep.subr.msk.mxu0 %vm273_vm1, %v924_v51  ;;  %v1257_v54 = vpop.permute.xlu1 %1256  ;;  %3511 = vmatpush3.msk.msra.mxu1 %vm273_vm1, %v1090_v50  ;;  %v1774_v50 = vsub.s32 1, %v4020_v38 }
  0xad   : > { %3512 = vmatprep.mubr.msk.f32.mxu1 %vm3740_vm0, %v3739_v1  ;;  %3515 = vmatprep.subr.mxu1 %v3739_v1 }
  0xae   : > { %v1086_v56 = vpop.permute.xlu0 %1085  ;;  %3513 = vmatmul.mubr.msk.f32.vlgmr.msra.gmra.mrb[10].mxu1 %vm269_vm3, %v3396_v55 }
  0xaf   : > { %3517 = vmatprep.mubr.msk.f32.mxu1 %vm3740_vm0, %v3739_v1  ;;  %v1092_v0 = vsel %vm1091_vm7, %v1086_v56, %v1088_v53  ;;  %v1775_v56 = vrot.slane %v1766_v41, %v1774_v50 }
  0xb0   : > { %v1255_v59 = vpop.permute.xlu1 %1254 }
  0xb1   : > { %v1261_v7 = vsel %vm1260_vm8, %v1255_v59, %v1257_v54 }
  0xb2   : > { %3387 = vmatmul.mubr.msk.f32.vlgmr.msra.gmra.mrb[0].mxu0 %vm269_vm3, %v3384_v47  ;;  %v1259_v60 = vpop.permute.xlu0 %1258 }
  0xb3   : > { %3392 = vmatpush1.msk.msra.mxu0 %vm273_vm1, %v923_v57  ;;  %998 = vmatprep.mubr.f32.mxu0 %v3739_v1  ;;  %v1262_v3 = vsel %vm1260_vm8, %v1257_v54, %v1259_v60 }
  0xb4   : > { %3397 = vmatprep.subr.msk.mxu0 %vm273_vm1, %v1093_v58  ;;  %3516 = vmatpush3.msk.msra.mxu1 %vm273_vm1, %v1259_v60  ;;  %v1428_v62 = vpop.permute.xlu1 %1427 }
  0xb5   : > { %3520 = vmatprep.subr.mxu1 %v3739_v1  ;;  %3518 = vmatmul.mubr.msk.f32.vlgmr.msra.gmra.mrb[12].mxu1 %vm269_vm3, %v3402_v61 }
  0xb6   : > { %v1426_v63 = vpop.permute.xlu0 %1425  ;;  %3521 = vmatpush3.msk.msra.mxu1 %vm273_vm1, %v1428_v62  ;;  %3522 = vmatprep.mubr.msk.f32.mxu1 %vm3740_vm0, %v3739_v1 }
  0xb7   : > { %3525 = vmatprep.subr.mxu1 %v3739_v1  ;;  %v1431_v8 = vsel %vm1429_vm9, %v1426_v63, %v1428_v62  ;;  %v3243_v62 = vld [vmem:[#allocation3] sm:$0x1] }
  0xb8   : > { %v1595_v9 = vpop.permute.xlu1 %1594 }
  0xb9   : > { %3523 = vmatmul.mubr.msk.f32.vlgmr.msra.gmra.mrb[14].mxu1 %vm269_vm3, %v3408_v2 }
  0xba   : > { %3393 = vmatmul.mubr.msk.f32.vlgmr.msra.gmra.mrb[0].mxu0 %vm269_vm3, %v3390_v52  ;;  %v1424_v4 = vpop.permute.xlu0 %1423  ;;  %3527 = vmatprep.mubr.msk.f32.mxu1 %vm3740_vm0, %v3739_v1  ;;  %v1771_v52 = vrot.slane %v1766_v41, %v1770_v49 }
  0xbb   : > { %3398 = vmatpush1.msk.msra.mxu0 %vm273_vm1, %v1092_v0  ;;  %1167 = vmatprep.mubr.f32.mxu0 %v3739_v1  ;;  %v1430_v10 = vsel %vm1429_vm9, %v1424_v4, %v1426_v63 }
  0xbc   : > { %3403 = vmatprep.subr.msk.mxu0 %vm273_vm1, %v1262_v3  ;;  %v1593_v12 = vpop.permute.xlu1 %1592 }
  0xbd   : > { %v1599_v13 = vsel %vm1598_vm10, %v1593_v12, %v1595_v9 }
  0xbe   : > { %v1597_v6 = vpop.permute.xlu0 %1596 }
  0xbf   : > { %3526 = vmatpush3.msk.msra.mxu1 %vm273_vm1, %v1597_v6  ;;  %v1600_v11 = vsel %vm1598_vm10, %v1595_v9, %v1597_v6  ;;  %v3420_v6 = vld [vmem:[%s4229_s3 + $0x1] sm:$0x1] }
  0xc0   : > { %3528 = vmatmul.mubr.msk.f32.vlgmr.msra.gmra.mrb[16].mxu1 %vm269_vm3, %v3414_v5  ;;  %3530 = vmatprep.subr.mxu1 %v3739_v1 }
  0xc1   : > { %3532 = vmatprep.mubr.msk.f32.mxu1 %vm3740_vm0, %v3739_v1 }
  0xc2   : > { %3399 = vmatmul.mubr.msk.f32.vlgmr.msra.gmra.mrb[0].mxu0 %vm269_vm3, %v3396_v55 }
  0xc3   : > { %3404 = vmatpush1.msk.msra.mxu0 %vm273_vm1, %v1261_v7  ;;  %1336 = vmatprep.mubr.f32.mxu0 %v3739_v1 }
  0xc4   : > { %3409 = vmatprep.subr.msk.mxu0 %vm273_vm1, %v1431_v8 }
  0xca   : > { %3405 = vmatmul.mubr.msk.f32.vlgmr.msra.gmra.mrb[0].mxu0 %vm269_vm3, %v3402_v61 }
  0xcb   : > { %3410 = vmatpush1.msk.msra.mxu0 %vm273_vm1, %v1430_v10  ;;  %1505 = vmatprep.mubr.f32.mxu0 %v3739_v1 }
  0xcc   : > { %3415 = vmatprep.subr.msk.mxu0 %vm273_vm1, %v1600_v11 }
  0xcf   : > { %v1758_v42 = vpop.permute.xlu0 %1757 }
  0xd2   : > { %3411 = vmatmul.mubr.msk.f32.vlgmr.msra.gmra.mrb[0].mxu0 %vm269_vm3, %v3408_v2 }
  0xd3   : > { %3416 = vmatpush1.msk.msra.mxu0 %vm273_vm1, %v1599_v13  ;;  %1674 = vmatprep.mubr.f32.mxu0 %v3739_v1  ;;  %v1807_v63 = vpop.permute.xlu0 %1806  ;;  %vm2135_vm1 = vcmask 138240  }
  0xda   : > { %3417 = vmatmul.mubr.msk.f32.vlgmr.msra.gmra.mrb[0].mxu0 %vm269_vm3, %v3414_v5  ;;  %vm2299_vm3 = vcmask 7168  }
  0xdb   : > { %1889 = vmatprep.mubr.f32.mxu0 %v3739_v1 }
 0x16b   : > { %v417_v14 = vpop.f32.mrb[0].mxu1 }
 0x16c   : > { %v3489_v15 = vpop.f32.mrb[1].mxu1 }
 0x171   : > { %v567_v16 = vpop.f32.mrb[2].mxu1 }
 0x172   : > { %v568_v17 = vadd.f32 %v567_v16, %v417_v14  ;;  %v3494_v18 = vpop.f32.mrb[3].mxu1  ;;  %v1799_v14 = vld [vmem:[%s4229_s3] sm:$0x1] }
 0x175   : > { %v733_v19 = vpop.f32.mrb[4].mxu1 }
 0x176   : > { %v739_v20 = vadd.f32 %v733_v19, %v568_v17  ;;  %v3499_v21 = vpop.f32.mrb[5].mxu1 }
 0x179   : > { %v902_v22 = vpop.f32.mrb[6].mxu1 }
 0x17a   : > { %v908_v23 = vadd.f32 %v902_v22, %v739_v20  ;;  %v3504_v24 = vpop.f32.mrb[7].mxu1 }
 0x17d   : > { %v1071_v25 = vpop.f32.mrb[8].mxu1 }
 0x17e   : > { %v1077_v26 = vadd.f32 %v1071_v25, %v908_v23  ;;  %v3509_v27 = vpop.f32.mrb[9].mxu1  ;;  %v3425_v23 = vld [vmem:[%s4229_s3 + $0x2] sm:$0x1] }
 0x181   : > { %v1240_v28 = vpop.f32.mrb[10].mxu1 }
 0x182   : > { %v1246_v29 = vadd.f32 %v1240_v28, %v1077_v26  ;;  %v3514_v30 = vpop.f32.mrb[11].mxu1 }
 0x188   : > { %v1409_v31 = vpop.f32.mrb[12].mxu1 }
 0x189   : > { %v1415_v32 = vadd.f32 %v1409_v31, %v1246_v29  ;;  %v3519_v33 = vpop.f32.mrb[13].mxu1  ;;  %v3428_v29 = vld [vmem:[%s4229_s3 + $0x3] sm:$0x1] }
 0x18c   : > { %v1578_v35 = vpop.f32.mrb[14].mxu1 }
 0x18d   : > { %v1584_v36 = vadd.f32 %v1578_v35, %v1415_v32  ;;  %v3524_v37 = vpop.f32.mrb[15].mxu1 }
 0x193   : > { %v1747_v40 = vpop.f32.mrb[16].mxu1 }
 0x194   : > { %v1753_v43 = vadd.f32 %v1747_v40, %v1584_v36  ;;  %v3529_v44 = vpop.f32.mrb[17].mxu1  ;;  %v3431_v36 = vld [vmem:[%s4229_s3 + $0x4] sm:$0x1] }
 0x196   : > { %v1762_v46 = vadd.f32 %v1758_v42, %v1753_v43 }
 0x198   : > { %v1765_v47 = vmax.f32 %v1762_v46, 0.0 }
 0x19a   : > { %v1785_v48 = vmul.f32 %v1779_v45, %v1765_v47  ;;  %v3434_v45 = vld [vmem:[%s4229_s3 + $0x5] sm:$0x1] }
 0x19c   : > { %1794 = vst.msk [vmem:[#allocation2 + $0x18] sm:$0xff] %vm1793_vm12, %v1785_v48 }
 0x1a3   : > { %v4045_v61 = vld [vmem:[#allocation2 + $0x18] sm:$0xff] }
 0x1ad   : > { %v1676_v51 = vpop.f32.mrb[0].mxu0 }
 0x1ae   : > { %v1760_v53 = vadd.f32 %v1758_v42, %v1676_v51  ;;  %v1678_v54 = vpop.f32.mrb[1].mxu0  ;;  %v3437_v51 = vld [vmem:[%s4229_s3 + $0x6] sm:$0x1] }
 0x1af   : > { %v1761_v55 = vadd.f32 %v1758_v42, %v1678_v54 }
 0x1b0   : > { %v1763_v57 = vmax.f32 %v1760_v53, 0.0 }
 0x1b1   : > { %v1764_v58 = vmax.f32 %v1761_v55, 0.0  ;;  %v3440_v55 = vld [vmem:[%s4229_s3 + $0x7] sm:$0x1] }
 0x1b2   : > { %v4030_v59 = vmul.f32 %v1771_v52, %v1763_v57  ;;  %v3443_v57 = vld [vmem:[%s4229_s3 + $0x8] sm:$0x1] }
 0x1b3   : > { %v4032_v60 = vmul.f32 %v1775_v56, %v1764_v58 }
 0x1b4   : > { %1808 = vrot.lane.b32.xlu1 %v4030_v59, %s3750_s14 }
 0x1b5   : > { %1970 = vrot.lane.b32.xlu0 %v4032_v60, %s3751_s20 }
 0x1b8   : > { %1810 = vrot.lane.b32.xlu1 %v4032_v60, %s3750_s14 }
 0x1b9   : > { %2129 = vrot.lane.b32.xlu0 %v4030_v59, %s3752_s21 }
 0x1bc   : > { %1968 = vrot.lane.b32.xlu1 %v4030_v59, %s3751_s20 }
 0x1bd   : > { %2127 = vrot.lane.b32.xlu0 %v3739_v1, %s3752_s21 }
 0x1c0   : > { %1966 = vrot.lane.b32.xlu1 %v3739_v1, %s3751_s20 }
 0x1c1   : > { %2295 = vrot.lane.b32.xlu0 %v4032_v60, %s3753_s22 }
 0x1c4   : > { %2131 = vrot.lane.b32.xlu1 %v4032_v60, %s3752_s21 }
 0x1c5   : > { %1812 = vrot.lane.b32.xlu0 %v4045_v61, %s3750_s14  ;;  %s4184_s14 = scalar_lea.hbm %s4232_s6, %s3609_s30 }
 0x1c8   : > { %2293 = vrot.lane.b32.xlu1 %v4030_v59, %s3753_s22 }
 0x1c9   : > { %2604 = vrot.lane.b32.xlu0 %v4030_v59, %s3741_s15 }
 0x1cc   : > { %2291 = vrot.lane.b32.xlu1 %v3739_v1, %s3753_s22 }
 0x1cd   : > { %2606 = vrot.lane.b32.xlu0 %v4032_v60, %s3741_s15 }
 0x1d0   : > { %1972 = vrot.lane.b32.xlu1 %v4045_v61, %s3751_s20  ;;  %s3679_s20 = sshll.u32 %s3756_s4, 4  ;;  %s3680_s20 = int_to_ptr.vmem [resolvable:$false] %s3679_s20 }
 0x1d1   : > { %2297 = vrot.lane.b32.xlu0 %v4045_v61, %s3753_s22 }
 0x1d4   : > { %2608 = vrot.lane.b32.xlu1 %v4045_v61, %s3741_s15 }
 0x1d5   : > { %2768 = vrot.lane.b32.xlu0 %v4045_v61, %s3754_s27 }
 0x1d8   : > { %2133 = vrot.lane.b32.xlu1 %v4045_v61, %s3752_s21  ;;  %s3681_s21 = scalar_lea.vmem %s3680_s20, 96 }
 0x1d9   : > { %2927 = vrot.lane.b32.xlu0 %v4032_v60, %s3743_s17 }
 0x1dc   : > { %2766 = vrot.lane.b32.xlu1 %v4032_v60, %s3754_s27 }
 0x1dd   : > { %2925 = vrot.lane.b32.xlu0 %v4030_v59, %s3743_s17 }
 0x1e0   : > { %2764 = vrot.lane.b32.xlu1 %v4030_v59, %s3754_s27 }
 0x1e1   : > { %3089 = vrot.lane.b32.xlu0 %v4045_v61, %s3744_s18 }
 0x1e4   : > { %2929 = vrot.lane.b32.xlu1 %v4045_v61, %s3743_s17  ;;  %s244_s17 = sand.u32 1, %s3729_s24  }
 0x1e5   : > { %3246 = vperm.xlu0 %3666, %v3243_v62   ;;  %s3289_s16 = scalar_lea.sflag [#allocation5], %s244_s17 }
 0x1e8   : > { %3087 = vrot.lane.b32.xlu1 %v4032_v60, %s3744_s18 }
 0x1ec   : > { %3085 = vrot.lane.b32.xlu1 %v4030_v59, %s3744_s18  ;;  %s3607_s18 = smul.u32 3, %s244_s17 }
 0x1ee   : > { %s246_s10 = scalar_lea.vmem [#allocation4], %s3607_s18 }
 0x1ef   : > { %s3303_s11 = sshll.u32 %s246_s10, 4  ;;  %s4186_s11 = int_to_ptr.vmem [resolvable:$true] %s3303_s11 }
 0x1f0   : > { %s3675_s19 = scalar_lea.vmem %s4186_s11, 48  ;;  %p3682_p0 = scmp.lt.s32.totalorder %s4186_s11, %s3680_s20 }
 0x1f1   : > { %p3676_p11 = scmp.ne.s32.totalorder %s4186_s11, %s3675_s19  ;;  %p3683_p1 = scmp.lt.s32.totalorder %s3681_s21, %s3675_s19 }
 0x1f3   : > { %p3677_p12 = pnand %p3676_p11, %p3833_p5  ;;  %p3684_p2 = por %p3683_p1, %p3682_p0 }
 0x1f5   : > { %p3678_p13 = pneg %p3677_p12 }
 0x1f7   : > { %p3685_p3 = pnand %p3684_p2, %p3678_p13 }
 0x226   : > { %v1809_v0 = vpop.permute.xlu1 %1808 }
 0x227   : > { %v1971_v2 = vpop.permute.xlu0 %1970  ;;  %v1815_v7 = vsel %vm1814_vm13, %v1807_v63, %v1809_v0 }
 0x22a   : > { %v1811_v3 = vpop.permute.xlu1 %1810 }
 0x22b   : > { %v2130_v4 = vpop.permute.xlu0 %2129  ;;  %v1816_v5 = vsel %vm1814_vm13, %v1809_v0, %v1811_v3 }
 0x22c   : > { %1825 = vmatprep.subr.mxu0 %v1816_v5 }
 0x22d   : > { %1826 = vmatpush1.msra.mxu0 %v1815_v7 }
 0x22e   : > { %v1969_v8 = vpop.permute.xlu1 %1968  ;;  %3421 = vmatmul.mubr.msk.f32.vlgmr.msra.gmra.mrb[2].mxu0 %vm1821_vm14, %v3420_v6 }
 0x22f   : > { %v2128_v9 = vpop.permute.xlu0 %2127  ;;  %v1976_v10 = vsel %vm1974_vm15, %v1969_v8, %v1971_v2  ;;  %2048 = vmatprep.mubr.f32.mxu0 %v3739_v1 }
 0x230   : > { %1984 = vmatprep.subr.mxu0 %v1976_v10  ;;  %v2136_v18 = vsel %vm2135_vm1, %v2128_v9, %v2130_v4 }
 0x232   : > { %v1967_v11 = vpop.permute.xlu1 %1966 }
 0x233   : > { %v1975_v12 = vsel %vm1974_vm15, %v1967_v11, %v1969_v8  ;;  %v2296_v13 = vpop.permute.xlu0 %2295 }
 0x234   : > { %1985 = vmatpush1.msra.mxu0 %v1975_v12 }
 0x236   : > { %v2132_v15 = vpop.permute.xlu1 %2131  ;;  %3423 = vmatmul.mubr.msk.f32.vlgmr.msra.gmra.mrb[2].mxu0 %vm1821_vm14, %v1799_v14 }
 0x237   : > { %v1813_v16 = vpop.permute.xlu0 %1812  ;;  %v2137_v17 = vsel %vm2135_vm1, %v2130_v4, %v2132_v15  ;;  %2209 = vmatprep.mubr.f32.mxu0 %v3739_v1 }
 0x238   : > { %v1817_v19 = vsel %vm1814_vm13, %v1811_v3, %v1813_v16  ;;  %2145 = vmatprep.subr.mxu0 %v2137_v17 }
 0x239   : > { %3531 = vmatpush3.msra.mxu1 %v1817_v19  ;;  %2146 = vmatpush1.msra.mxu0 %v2136_v18 }
 0x23a   : > { %v2294_v20 = vpop.permute.xlu1 %2293  ;;  %3535 = vmatprep.subr.mxu1 %v3739_v1  ;;  %3533 = vmatmul.mubr.msk.f32.vlgmr.msra.gmra.mrb[18].mxu1 %vm1821_vm14, %v3420_v6 }
 0x23b   : > { %v2605_v21 = vpop.permute.xlu0 %2604  ;;  %v2301_v22 = vsel %vm2299_vm3, %v2294_v20, %v2296_v13  ;;  %3537 = vmatprep.mubr.msk.f32.mxu1 %vm3740_vm0, %v3739_v1 }
 0x23c   : > { %2309 = vmatprep.subr.mxu0 %v2301_v22  ;;  %v3755_v22 = vmov 1966171168  }
 0x23e   : > { %v2292_v24 = vpop.permute.xlu1 %2291  ;;  %3426 = vmatmul.mubr.msk.f32.vlgmr.msra.gmra.mrb[2].mxu0 %vm1821_vm14, %v3425_v23 }
 0x23f   : > { %v2300_v25 = vsel %vm2299_vm3, %v2292_v24, %v2294_v20  ;;  %2373 = vmatprep.mubr.f32.mxu0 %v3739_v1  ;;  %v2607_v26 = vpop.permute.xlu0 %2606 }
 0x240   : > { %2310 = vmatpush1.msra.mxu0 %v2300_v25  ;;  %v2610_v40 = vsel %vm266_vm2, %v2605_v21, %v2607_v26 }
 0x241   : > { %2458 = vmatprep.subr.mxu0 %v4032_v60 }
 0x242   : > { %v1973_v27 = vpop.permute.xlu1 %1972 }
 0x243   : > { %v1977_v28 = vsel %vm1974_vm15, %v1971_v2, %v1973_v27  ;;  %v2298_v30 = vpop.permute.xlu0 %2297 }
 0x244   : > { %3536 = vmatpush3.msra.mxu1 %v1977_v28  ;;  %v2302_v39 = vsel %vm2299_vm3, %v2296_v13, %v2298_v30 }
 0x245   : > { %3538 = vmatmul.mubr.msk.f32.vlgmr.msra.gmra.mrb[20].mxu1 %vm1821_vm14, %v1799_v14  ;;  %3540 = vmatprep.subr.mxu1 %v3739_v1 }
 0x246   : > { %v2609_v31 = vpop.permute.xlu1 %2608  ;;  %3429 = vmatmul.mubr.msk.f32.vlgmr.msra.gmra.mrb[2].mxu0 %vm1821_vm14, %v3428_v29  ;;  %3542 = vmatprep.mubr.msk.f32.mxu1 %vm3740_vm0, %v3739_v1 }
 0x247   : > { %2459 = vmatpush1.msra.mxu0 %v4030_v59  ;;  %v2611_v32 = vsel %vm266_vm2, %v2607_v26, %v2609_v31  ;;  %2522 = vmatprep.mubr.f32.mxu0 %v3739_v1  ;;  %v2769_v37 = vpop.permute.xlu0 %2768 }
 0x248   : > { %2618 = vmatprep.subr.mxu0 %v2611_v32 }
 0x24a   : > { %v2134_v33 = vpop.permute.xlu1 %2133 }
 0x24b   : > { %v2138_v35 = vsel %vm2135_vm1, %v2132_v15, %v2134_v33  ;;  %v2928_v43 = vpop.permute.xlu0 %2927 }
 0x24c   : > { %3541 = vmatpush3.msra.mxu1 %v2138_v35 }
 0x24d   : > { %3543 = vmatmul.mubr.msk.f32.vlgmr.msra.gmra.mrb[22].mxu1 %vm1821_vm14, %v3425_v23  ;;  %3545 = vmatprep.subr.mxu1 %v3739_v1  ;;  %v3261_v23 = vunpack.c.l.s4 %v3755_v22 }
 0x24e   : > { %v2767_v41 = vpop.permute.xlu1 %2766  ;;  %3546 = vmatpush3.msra.mxu1 %v2302_v39  ;;  %3432 = vmatmul.mubr.msk.f32.vlgmr.msra.gmra.mrb[2].mxu0 %vm1821_vm14, %v3431_v36 }
 0x24f   : > { %2619 = vmatpush1.msra.mxu0 %v2610_v40  ;;  %3547 = vmatprep.mubr.msk.f32.mxu1 %vm3740_vm0, %v3739_v1  ;;  %v2772_v42 = vsel %vm2770_vm4, %v2767_v41, %v2769_v37  ;;  %v2926_v50 = vpop.permute.xlu0 %2925  ;;  %v3262_v25 = vunpack.c.0.s8 %v3261_v23 }
 0x250   : > { %3550 = vmatprep.subr.mxu1 %v3739_v1  ;;  %2779 = vmatprep.subr.mxu0 %v2772_v42  ;;  %v2931_v53 = vsel %vm753_vm5, %v2926_v50, %v2928_v43 }
 0x251   : > { %3548 = vmatmul.mubr.msk.f32.vlgmr.msra.gmra.mrb[24].mxu1 %vm1821_vm14, %v3428_v29  ;;  %2682 = vmatprep.mubr.f32.mxu0 %v3739_v1 }
 0x252   : > { %3551 = vmatpush3.msra.mxu1 %v4045_v61  ;;  %v2765_v44 = vpop.permute.xlu1 %2764  ;;  %3552 = vmatprep.mubr.msk.f32.mxu1 %vm3740_vm0, %v3739_v1 }
 0x253   : > { %3555 = vmatprep.subr.mxu1 %v3739_v1  ;;  %v2771_v46 = vsel %vm2770_vm4, %v2765_v44, %v2767_v41  ;;  %v3090_v54 = vpop.permute.xlu0 %3089 }
 0x255   : > { %3553 = vmatmul.mubr.msk.f32.vlgmr.msra.gmra.mrb[26].mxu1 %vm1821_vm14, %v3431_v36 }
 0x256   : > { %3556 = vmatpush3.msra.mxu1 %v2609_v31  ;;  %v2930_v47 = vpop.permute.xlu1 %2929  ;;  %3435 = vmatmul.mubr.msk.f32.vlgmr.msra.gmra.mrb[2].mxu0 %vm1821_vm14, %v3434_v45  ;;  %v3265_v31 = vsub.s32 %v3262_v25, %v4020_v38 }
 0x257   : > { %2780 = vmatpush1.msra.mxu0 %v2771_v46  ;;  %3557 = vmatprep.mubr.msk.f32.mxu1 %vm3740_vm0, %v3739_v1  ;;  %v2932_v48 = vsel %vm753_vm5, %v2928_v43, %v2930_v47 }
 0x258   : > { %3560 = vmatprep.subr.mxu1 %v3739_v1  ;;  %2939 = vmatprep.subr.mxu0 %v2932_v48 }
 0x259   : > { %3558 = vmatmul.mubr.msk.f32.vlgmr.msra.gmra.mrb[28].mxu1 %vm1821_vm14, %v3434_v45  ;;  %2843 = vmatprep.mubr.f32.mxu0 %v3739_v1 }
 0x25a   : > { %3561 = vmatpush3.msra.mxu1 %v2769_v37  ;;  %3562 = vmatprep.mubr.msk.f32.mxu1 %vm3740_vm0, %v3739_v1  ;;  %v3088_v52 = vpop.permute.xlu1 %3087 }
 0x25b   : > { %3565 = vmatprep.subr.mxu1 %v3739_v1  ;;  %v3092_v56 = vsel %vm922_vm6, %v3088_v52, %v3090_v54 }
 0x25d   : > { %3563 = vmatmul.mubr.msk.f32.vlgmr.msra.gmra.mrb[30].mxu1 %vm1821_vm14, %v3437_v51 }
 0x25e   : > { %3566 = vmatpush3.msra.mxu1 %v2930_v47  ;;  %3438 = vmatmul.mubr.msk.f32.vlgmr.msra.gmra.mrb[2].mxu0 %vm1821_vm14, %v3437_v51  ;;  %v3086_v58 = vpop.permute.xlu1 %3085 }
 0x25f   : > { %2940 = vmatpush1.msra.mxu0 %v2931_v53  ;;  %3567 = vmatprep.mubr.msk.f32.mxu1 %vm3740_vm0, %v3739_v1  ;;  %v3091_v59 = vsel %vm922_vm6, %v3086_v58, %v3088_v52 }
 0x260   : > { %3099 = vmatprep.subr.mxu0 %v3092_v56  ;;  %3570 = vmatprep.subr.mxu1 %v3739_v1 }
 0x261   : > { %3568 = vmatmul.mubr.msk.f32.vlgmr.msra.gmra.mrb[32].mxu1 %vm1821_vm14, %v3440_v55  ;;  %3003 = vmatprep.mubr.f32.mxu0 %v3739_v1 }
 0x262   : > { %3571 = vmatpush3.msra.mxu1 %v3090_v54  ;;  %3572 = vmatprep.mubr.msk.f32.mxu1 %vm3740_vm0, %v3739_v1  ;;  %vm3285_vm0 = vcmp.lt.s32.totalorder %v1768_v34, 288 }
 0x264   : > { %v3247_v24 = vpop.permute.xlu0 %3246 }
 0x265   : > { %3573 = vmatmul.mubr.msk.f32.vlgmr.msra.gmra.mrb[34].mxu1 %vm1821_vm14, %v3443_v57  ;;  %v3252_v26 = vrot.slane %v3247_v24, %v1770_v49 }
 0x266   : > { %3441 = vmatmul.mubr.msk.f32.vlgmr.msra.gmra.mrb[2].mxu0 %vm1821_vm14, %v3440_v55 }
 0x267   : > { %3100 = vmatpush1.msra.mxu0 %v3091_v59  ;;  %3163 = vmatprep.mubr.f32.mxu0 %v3739_v1 }
 0x26e   : > { %3444 = vmatmul.mubr.msk.f32.vlgmr.msra.gmra.mrb[2].mxu0 %vm1821_vm14, %v3443_v57 }
 0x30d   : > { %v1962_v60 = vpop.f32.mrb[18].mxu1 }
 0x30e   : > { %v3534_v61 = vpop.f32.mrb[19].mxu1 }
 0x318   : > { %v2121_v62 = vpop.f32.mrb[20].mxu1 }
 0x319   : > { %v2122_v63 = vadd.f32 %v2121_v62, %v1962_v60  ;;  %v3539_v0 = vpop.f32.mrb[21].mxu1 }
 0x320   : > { %v2282_v2 = vpop.f32.mrb[22].mxu1 }
 0x321   : > { %v2288_v3 = vadd.f32 %v2282_v2, %v2122_v63  ;;  %v3544_v4 = vpop.f32.mrb[23].mxu1 }
 0x324   : > { %v2446_v5 = vpop.f32.mrb[24].mxu1 }
 0x325   : > { %v2452_v6 = vadd.f32 %v2446_v5, %v2288_v3  ;;  %v3549_v7 = vpop.f32.mrb[25].mxu1 }
 0x328   : > { %v2595_v8 = vpop.f32.mrb[26].mxu1 }
 0x329   : > { %v2601_v9 = vadd.f32 %v2595_v8, %v2452_v6  ;;  %v3554_v10 = vpop.f32.mrb[27].mxu1 }
 0x32c   : > { %v2755_v11 = vpop.f32.mrb[28].mxu1 }
 0x32d   : > { %v2761_v12 = vadd.f32 %v2755_v11, %v2601_v9  ;;  %v3559_v1 = vpop.f32.mrb[29].mxu1 }
 0x330   : > { %v2916_v13 = vpop.f32.mrb[30].mxu1 }
 0x331   : > { %v2922_v14 = vadd.f32 %v2916_v13, %v2761_v12  ;;  %v3564_v15 = vpop.f32.mrb[31].mxu1 }
 0x334   : > { %v3076_v16 = vpop.f32.mrb[32].mxu1 }
 0x335   : > { %v3082_v17 = vadd.f32 %v3076_v16, %v2922_v14  ;;  %v3569_v18 = vpop.f32.mrb[33].mxu1 }
 0x338   : > { %v3236_v19 = vpop.f32.mrb[34].mxu1 }
 0x339   : > { %v3242_v20 = vadd.f32 %v3236_v19, %v3082_v17  ;;  %v3574_v21 = vpop.f32.mrb[35].mxu1 }
 0x33b   : > { %v3255_v30 = vadd.f32 %v3252_v26, %v3242_v20 }
 0x33d   : > { %v3273_v35 = vrot.slane %v3255_v30, %v3265_v31 }
 0x341   : > { %v3165_v27 = vpop.f32.mrb[2].mxu0 }
 0x342   : > { %v3253_v28 = vadd.f32 %v3252_v26, %v3165_v27  ;;  %v3167_v29 = vpop.f32.mrb[3].mxu0 }
 0x343   : > { %v3254_v32 = vadd.f32 %v3252_v26, %v3167_v29 }
 0x345   : > { %v3259_v33 = vcombine.low %v3253_v28, %v3254_v32 }
 0x347   : > { %v3266_v36 = vrot.slane %v3259_v33, %v3265_v31 }
 0x349   : > { %v3274_v37 = vcombine.low %v3266_v36, %v3273_v35 }
 0x34b   : > { %v3281_v39 = vrot.slane %v3274_v37, %v3265_v31 }
 0x34d   : > { %3287 = vst.msk [vmem:[%s246_s10] sm:$0x7] %vm3285_vm0, %v3281_v39 }
 0x34e   : > { %3688 = shalt.err (!%p3685_p3)
}
 0x34f   : > { %s3689_s22 = scalar_lea.hbm %s4184_s14, 48  ;;  %s3693_s29 = scalar_lea.hbm %s4232_s6, 96 }
 0x350   : > { %p3690_p4 = scmp.ne.s32.totalorder %s4184_s14, %s3689_s22  ;;  %p3694_p9 = scmp.lt.u32.totalorder %s4184_s14, %s4232_s6 }
 0x351   : > { %p3695_p10 = scmp.lt.u32.totalorder %s3693_s29, %s3689_s22  ;;  %p3697_p12 = scmp.lt.u32.totalorder %s3689_s22, %s4184_s14 }
 0x352   : > { %p3691_p7 = pnand %p3690_p4, %p3833_p5 }
 0x353   : > { %p3696_p11 = por %p3695_p10, %p3694_p9 }
 0x354   : > { %p3692_p8 = pneg %p3691_p7 }
 0x355   : > { %p3698_p13 = por %p3697_p12, %p3696_p11 }
 0x357   : > { %p3699_p0 = pnand %p3698_p13, %p3692_p8 }
 0x359   : > { %3702 = shalt.err (!%p3699_p0)
}
 0x35a   : > { %3610 = dma.vmem_to_hbm [thread:$0]  (%p3833_p5), %s4186_s11, 48, %s4184_s14, %s3289_s16  }
 0x35b PF: > { %p3616_p1 = scmp.ge.s32.totalorder %s3737_s26, 2  ;;  %s3315_s30 = sand.u32 1, %s3725_s23  }
 0x35c   : > { %s3316_s10 = scalar_lea.sflag [#allocation5], %s3315_s30 }
 0x35d   : > { %p3613_p2 = pnand %p3616_p1, %p3837_p6 }
 0x35f   : > { %3720 = dma.done.wait (!%p3613_p2), %s3316_s10, 48  }
 0x360   : > { %3722 = vsyncadd (!%p3613_p2), %s3316_s10, 4294967248  ;;  %p18_p3 = scmp.ge.s32.totalorder %s3820_s28, 4   ;;  %s4235_s23 = smov %s3729_s24 }
 0x361   : > { %s4236_s24 = smov %s3733_s25  ;;  %s4237_s25 = smov %s3831_s7 }
 0x362   : > { %s4238_s26 = smov %s3820_s28  ;;  %20 = sbr.rel (!%p18_p3) target bundleno = 6 (0x6), region = 95 }
 0x369   :  { %3321 = vsyncpa [#allocation5], 1 }
 0x36a   :  { %3323 = vsyncpa [#allocation5 + $0x1], 1 }

</bundles_post_ra>
